<compile_context>
chip_gen: v7x
topology: tpu7x:2x2x1
jax: 0.10.0
libtpu: 0.0.40
codegen_flags: <defaults>
</compile_context>

<pallas_src>
import math

import jax
import jax.numpy as jnp
from jax.experimental import pallas as pl
from jax.experimental.pallas import tpu as pltpu


def _identity_kernel(x_ref, o_ref):
    # Straight copy of the current tile (VMEM -> VMEM registers -> VMEM).
    o_ref[...] = x_ref[...]


# ~2 MiB per block => in+out double-buffered footprint ~8 MiB, safe on
# v5e (16 MiB scoped default), v6e (32 MiB) and v7x (32 MiB scoped / 64 MiB phys).
_TARGET_BLOCK_BYTES = 2 * 1024 * 1024


def _copy_2d(x2: jax.Array) -> jax.Array:
    """Tiled identity copy of a lane-dense 2D array (cols % 128 == 0)."""
    R, C = x2.shape
    itemsize = jnp.dtype(x2.dtype).itemsize
    # Sublane packing: 8 rows for 32-bit, 16 for 16-bit, 32 for 8-bit dtypes.
    sub = 8 * max(1, 4 // itemsize)

    # Row-block sized to ~_TARGET_BLOCK_BYTES, rounded to the packing multiple.
    br = _TARGET_BLOCK_BYTES // (C * itemsize)
    br = max(sub, (br // sub) * sub)
    if br >= R:
        br = R  # full extent is always a legal block size

    grid = (pl.cdiv(R, br),)
    nbytes = R * C * itemsize

    return pl.pallas_call(
        _identity_kernel,
        out_shape=jax.ShapeDtypeStruct((R, C), x2.dtype),
        grid_spec=pltpu.PrefetchScalarGridSpec(
            num_scalar_prefetch=0,
            grid=grid,
            in_specs=[pl.BlockSpec((br, C), lambda i: (i, 0))],
            out_specs=pl.BlockSpec((br, C), lambda i: (i, 0)),
        ),
        compiler_params=pltpu.CompilerParams(
            # Independent row blocks: shard across TensorCores (megacore / v7x 2-TC).
            dimension_semantics=("parallel",),
        ),
        # Identity: let XLA alias the output buffer onto the input buffer.
        input_output_aliases={0: 0},
        cost_estimate=pl.CostEstimate(
            flops=0, transcendentals=0, bytes_accessed=2 * nbytes
        ),
    )(x2)


def idt_block_forward(x: jax.Array) -> jax.Array:
    """Identity forward pass (IDT_Block.forward) via a lane-dense Pallas copy."""
    orig_shape = x.shape
    total = int(x.size)
    if total == 0:
        return x  # nothing to stream

    flat = x.reshape(-1)

    # Widest lane-dense column width (multiple of 128) that divides the size.
    cols = None
    for c in (1024, 512, 256, 128):
        if total % c == 0:
            cols = c
            break

    pad = 0
    if cols is None:
        # Ragged total: pad to a multiple of the lane-dense width, slice back.
        cols = 1024
        pad = (-total) % cols
        flat = jnp.pad(flat, (0, pad))

    x2 = flat.reshape(-1, cols)
    y2 = _copy_2d(x2)

    y = y2.reshape(-1)
    if pad:
        y = y[:total]
    return y.reshape(orig_shape)


if __name__ == "__main__":
    key = jax.random.PRNGKey(0)
    # Small NCHW input consistent with a conv-style block: B=2, C=4, H=W=16.
    x = jax.random.normal(key, (2, 4, 16, 16), dtype=jnp.float32)

    fwd = jax.jit(idt_block_forward)
    y = jax.block_until_ready(fwd(x))

    assert y.shape == x.shape, (y.shape, x.shape)
    assert y.dtype == x.dtype, (y.dtype, x.dtype)
    assert bool(jnp.array_equal(y, x)), "identity kernel output mismatch"

    print("KERNEL_OK")
</pallas_src>

<mosaic_0001>
module attributes {stable_mosaic.version = 11 : i64} {
  func.func @_identity_kernel(%arg0: i32, %arg1: memref<2x1024xf32, #tpu.memory_space<vmem>>, %arg2: memref<2x1024xf32, #tpu.memory_space<vmem>>) attributes {dimension_semantics = [#tpu.dimension_semantics<parallel>], iteration_bounds = array<i64: 1>, scalar_prefetch = 0 : i64, scratch_operands = 0 : i64, tpu.core_type = #tpu.core_type<tc>, window_params = [{transform_indices = @transform_0, window_bounds = array<i64: 2, 1024>}, {transform_indices = @transform_1, window_bounds = array<i64: 2, 1024>}]} {
    %c0 = arith.constant 0 : index
    %c0_0 = arith.constant 0 : index
    %0 = vector.load %arg1[%c0, %c0_0] : memref<2x1024xf32, #tpu.memory_space<vmem>>, vector<2x1024xf32>
    %c0_1 = arith.constant 0 : index
    %c0_2 = arith.constant 0 : index
    %1 = vector.load %arg2[%c0_1, %c0_2] : memref<2x1024xf32, #tpu.memory_space<vmem>>, vector<2x1024xf32>
    tpu.vector_store %arg2[%c0_1, %c0_2], %0 {strides = array<i32>} : memref<2x1024xf32, #tpu.memory_space<vmem>>, vector<2x1024xf32>,
    return
  }
  func.func @transform_0(%arg0: i32) -> (i32, i32) {
    %c0_i32 = arith.constant 0 : i32
    %c0_i32_0 = arith.constant 0 : i32
    return %arg0, %c0_i32 : i32, i32
  }
  func.func @transform_1(%arg0: i32) -> (i32, i32) {
    %c0_i32 = arith.constant 0 : i32
    %c0_i32_0 = arith.constant 0 : i32
    return %arg0, %c0_i32 : i32, i32
  }
}

</mosaic_0001>

<bundles_post_ra>
// kernel: idt_block_forward.1
= control target key start
LH: loop header
LB: loop body
LE: loop exit
PB: predicated region body
PF: predicated region fallthrough
CT: control target
= control target key end

     0   :  { %s38_s0 = inlined_call_operand.vmem [shape: f32[2,1024], index: 0, kind: input, shape index: {}, may-alias: {0,1}]   ;;  %s39_s1 = inlined_call_operand.vmem [shape: f32[2,1024], index: 1, kind: output, shape index: {}, may-alias: {0,1}]  }
   0x1   :  { %v8_v0 = vld [vmem:[%s38_s0] sm:$0xff]  ;;  %v9_v1 = vld [vmem:[%s38_s0 + $0x8] sm:$0xff] }
   0x2   :  { %10 = vst [vmem:[%s39_s1] sm:$0xff] %v8_v0  ;;  %11 = vst [vmem:[%s39_s1 + $0x8] sm:$0xff] %v9_v1 }

</bundles_post_ra>
